<compile_context>
chip_gen: v7x
topology: tpu7x:2x2x1
jax: 0.10.0
libtpu: 0.0.40
codegen_flags: <defaults>
</compile_context>

<pallas_src>
import functools

import jax
import jax.numpy as jnp
from jax.experimental import pallas as pl
from jax.experimental.pallas import tpu as pltpu


def _round_up(x: int, m: int) -> int:
    return ((x + m - 1) // m) * m


def _mlp_fused_kernel(*refs, num_layers, negative_slope):
    # refs layout: x_ref, w0, b0, w1, b1, ..., w_{L-1}, b_{L-1}, o_ref
    x_ref = refs[0]
    o_ref = refs[-1]
    wb = refs[1:-1]

    h = x_ref[...]  # [Bt, F0p] f32
    for i in range(num_layers):  # unrolled: layer dims differ, keep static
        w = wb[2 * i][...]       # [Fin_p, Fout_p]
        b = wb[2 * i + 1][...]   # [1, Fout_p]
        y = jnp.dot(h, w, preferred_element_type=jnp.float32) + b
        if i < num_layers - 1:
            # LeakyReLU (PyTorch default negative_slope=0.01), f32 epilogue.
            y = jnp.where(y >= 0, y, negative_slope * y)
        h = y
    o_ref[...] = h.astype(o_ref.dtype)


def _pad2d(a, rows, cols):
    if a.shape == (rows, cols):
        return a
    return jnp.zeros((rows, cols), a.dtype).at[: a.shape[0], : a.shape[1]].set(a)


def mlp_forward(x, params, *, negative_slope=0.01, max_block_b=256):
    """Fused MLP forward.

    x: [B, Fin] f32
    params: list of (w [Fin, Fout], b [Fout])   (w already transposed vs. PyTorch)
    """
    B, Fin = x.shape
    num_layers = len(params)
    dims = [Fin] + [w.shape[1] for (w, _) in params]
    out_features = dims[-1]

    # Lane-dense padding: features -> multiple of 128, batch -> multiple of 8.
    pdims = [_round_up(d, 128) for d in dims]
    block_b = min(_round_up(B, 8), _round_up(max_block_b, 8))
    Bp = _round_up(B, block_b)

    x_p = _pad2d(x, Bp, pdims[0])

    padded_inputs = [x_p]
    in_specs = [pl.BlockSpec((block_b, pdims[0]), lambda i: (i, 0))]
    flops = 0
    bytes_accessed = x_p.size * 4
    for li, (w, b) in enumerate(params):
        fin_p, fout_p = pdims[li], pdims[li + 1]
        w_p = _pad2d(w, fin_p, fout_p)
        b_p = _pad2d(b.reshape(1, -1), 1, fout_p)
        padded_inputs += [w_p, b_p]
        # Constant index_map -> weights/bias stay resident in VMEM across tiles.
        in_specs += [
            pl.BlockSpec((fin_p, fout_p), lambda i: (0, 0)),
            pl.BlockSpec((1, fout_p), lambda i: (0, 0)),
        ]
        flops += 2 * Bp * fin_p * fout_p
        bytes_accessed += (w_p.size + b_p.size) * 4
    bytes_accessed += Bp * pdims[-1] * 4

    kernel = functools.partial(
        _mlp_fused_kernel, num_layers=num_layers, negative_slope=negative_slope
    )

    out_p = pl.pallas_call(
        kernel,
        out_shape=jax.ShapeDtypeStruct((Bp, pdims[-1]), x.dtype),
        grid=(Bp // block_b,),
        in_specs=in_specs,
        out_specs=pl.BlockSpec((block_b, pdims[-1]), lambda i: (i, 0)),
        compiler_params=pltpu.CompilerParams(
            dimension_semantics=("parallel",),  # shards batch tiles across TCs (v7x)
        ),
        cost_estimate=pl.CostEstimate(
            flops=flops, transcendentals=0, bytes_accessed=bytes_accessed
        ),
    )(*padded_inputs)

    return out_p[:B, :out_features]


def init_mlp_params(key, num_layers, in_features, hidden_sizes, out_features):
    """Deterministic PyTorch-like init: U(-1/sqrt(fan_in), 1/sqrt(fan_in))."""
    dims = [in_features] + list(hidden_sizes) + [out_features]
    assert len(dims) == num_layers + 1
    params = []
    for i in range(num_layers):
        fan_in, fan_out = dims[i], dims[i + 1]
        key, kw, kb = jax.random.split(key, 3)
        bound = 1.0 / jnp.sqrt(jnp.float32(fan_in))
        # Stored directly as [fan_in, fan_out] (PyTorch weight transposed).
        w = jax.random.uniform(kw, (fan_in, fan_out), jnp.float32, -bound, bound)
        b = jax.random.uniform(kb, (fan_out,), jnp.float32, -bound, bound)
        params.append((w, b))
    return params


if __name__ == "__main__":
    # Module config: num_layers=3, in_features=16, hidden_sizes=[32, 32], out_features=8
    num_layers = 3
    in_features = 16
    hidden_sizes = [32, 32]
    out_features = 8
    batch = 8

    key = jax.random.PRNGKey(0)
    key, kx = jax.random.split(key)
    x = jax.random.normal(kx, (batch, in_features), dtype=jnp.float32)

    params = init_mlp_params(key, num_layers, in_features, hidden_sizes, out_features)

    out = mlp_forward(x, params)
    jax.block_until_ready(out)

    # Reference check in plain JAX.
    ref = x
    for i, (w, b) in enumerate(params):
        ref = ref @ w + b
        if i < len(params) - 1:
            ref = jnp.where(ref >= 0, ref, 0.01 * ref)
    assert out.shape == (batch, out_features)
    assert jnp.allclose(out, ref, atol=1e-5, rtol=1e-5)

    print("KERNEL_OK")
</pallas_src>

<mosaic_0001>
module attributes {stable_mosaic.version = 11 : i64} {
  func.func @_mlp_fused_kernel(%arg0: i32, %arg1: memref<8x128xf32, #tpu.memory_space<vmem>>, %arg2: memref<128x128xf32, #tpu.memory_space<vmem>>, %arg3: memref<1x128xf32, #tpu.memory_space<vmem>>, %arg4: memref<128x128xf32, #tpu.memory_space<vmem>>, %arg5: memref<1x128xf32, #tpu.memory_space<vmem>>, %arg6: memref<128x128xf32, #tpu.memory_space<vmem>>, %arg7: memref<1x128xf32, #tpu.memory_space<vmem>>, %arg8: memref<8x128xf32, #tpu.memory_space<vmem>>) attributes {dimension_semantics = [#tpu.dimension_semantics<parallel>], iteration_bounds = array<i64: 1>, scalar_prefetch = 0 : i64, scratch_operands = 0 : i64, tpu.core_type = #tpu.core_type<tc>, window_params = [{transform_indices = @transform_0, window_bounds = array<i64: 8, 128>}, {pipeline_mode = #tpu.pipeline_mode<synchronous>, transform_indices = @transform_1, window_bounds = array<i64: 128, 128>}, {pipeline_mode = #tpu.pipeline_mode<synchronous>, transform_indices = @transform_2, window_bounds = array<i64: 1, 128>}, {pipeline_mode = #tpu.pipeline_mode<synchronous>, transform_indices = @transform_3, window_bounds = array<i64: 128, 128>}, {pipeline_mode = #tpu.pipeline_mode<synchronous>, transform_indices = @transform_4, window_bounds = array<i64: 1, 128>}, {pipeline_mode = #tpu.pipeline_mode<synchronous>, transform_indices = @transform_5, window_bounds = array<i64: 128, 128>}, {pipeline_mode = #tpu.pipeline_mode<synchronous>, transform_indices = @transform_6, window_bounds = array<i64: 1, 128>}, {transform_indices = @transform_7, window_bounds = array<i64: 8, 128>}]} {
    %c0 = arith.constant 0 : index
    %c0_0 = arith.constant 0 : index
    %0 = vector.load %arg1[%c0, %c0_0] : memref<8x128xf32, #tpu.memory_space<vmem>>, vector<8x128xf32>
    %c0_1 = arith.constant 0 : index
    %c0_2 = arith.constant 0 : index
    %1 = vector.load %arg2[%c0_1, %c0_2] : memref<128x128xf32, #tpu.memory_space<vmem>>, vector<128x128xf32>
    %c0_3 = arith.constant 0 : index
    %c0_4 = arith.constant 0 : index
    %2 = vector.load %arg3[%c0_3, %c0_4] : memref<1x128xf32, #tpu.memory_space<vmem>>, vector<1x128xf32>
    %cst = arith.constant dense<0.000000e+00> : vector<8x128xf32>
    %3 = tpu.matmul %0, %1, %cst {dimension_numbers = #tpu.dot_dimension_numbers<[1], [0], [0], [1], [0, 0, 1, 1], [], []>} : vector<8x128xf32>, vector<128x128xf32>, vector<8x128xf32> -> vector<8x128xf32>
    %4 = vector.broadcast %2 : vector<1x128xf32> to vector<8x128xf32>
    %5 = arith.addf %3, %4 : vector<8x128xf32>
    %cst_5 = arith.constant 0.000000e+00 : f32
    %6 = vector.broadcast %cst_5 : f32 to vector<8x128xf32>
    %7 = arith.cmpf oge, %5, %6 : vector<8x128xf32>
    %cst_6 = arith.constant 0.00999999977 : f32
    %8 = vector.broadcast %cst_6 : f32 to vector<8x128xf32>
    %9 = arith.mulf %8, %5 : vector<8x128xf32>
    %10 = arith.select %7, %5, %9 : vector<8x128xi1>, vector<8x128xf32>
    %c0_7 = arith.constant 0 : index
    %c0_8 = arith.constant 0 : index
    %11 = vector.load %arg4[%c0_7, %c0_8] : memref<128x128xf32, #tpu.memory_space<vmem>>, vector<128x128xf32>
    %c0_9 = arith.constant 0 : index
    %c0_10 = arith.constant 0 : index
    %12 = vector.load %arg5[%c0_9, %c0_10] : memref<1x128xf32, #tpu.memory_space<vmem>>, vector<1x128xf32>
    %cst_11 = arith.constant dense<0.000000e+00> : vector<8x128xf32>
    %13 = tpu.matmul %10, %11, %cst_11 {dimension_numbers = #tpu.dot_dimension_numbers<[1], [0], [0], [1], [0, 0, 1, 1], [], []>} : vector<8x128xf32>, vector<128x128xf32>, vector<8x128xf32> -> vector<8x128xf32>
    %14 = vector.broadcast %12 : vector<1x128xf32> to vector<8x128xf32>
    %15 = arith.addf %13, %14 : vector<8x128xf32>
    %cst_12 = arith.constant 0.000000e+00 : f32
    %16 = vector.broadcast %cst_12 : f32 to vector<8x128xf32>
    %17 = arith.cmpf oge, %15, %16 : vector<8x128xf32>
    %cst_13 = arith.constant 0.00999999977 : f32
    %18 = vector.broadcast %cst_13 : f32 to vector<8x128xf32>
    %19 = arith.mulf %18, %15 : vector<8x128xf32>
    %20 = arith.select %17, %15, %19 : vector<8x128xi1>, vector<8x128xf32>
    %c0_14 = arith.constant 0 : index
    %c0_15 = arith.constant 0 : index
    %21 = vector.load %arg6[%c0_14, %c0_15] : memref<128x128xf32, #tpu.memory_space<vmem>>, vector<128x128xf32>
    %c0_16 = arith.constant 0 : index
    %c0_17 = arith.constant 0 : index
    %22 = vector.load %arg7[%c0_16, %c0_17] : memref<1x128xf32, #tpu.memory_space<vmem>>, vector<1x128xf32>
    %cst_18 = arith.constant dense<0.000000e+00> : vector<8x128xf32>
    %23 = tpu.matmul %20, %21, %cst_18 {dimension_numbers = #tpu.dot_dimension_numbers<[1], [0], [0], [1], [0, 0, 1, 1], [], []>} : vector<8x128xf32>, vector<128x128xf32>, vector<8x128xf32> -> vector<8x128xf32>
    %24 = vector.broadcast %22 : vector<1x128xf32> to vector<8x128xf32>
    %25 = arith.addf %23, %24 : vector<8x128xf32>
    %c0_19 = arith.constant 0 : index
    %c0_20 = arith.constant 0 : index
    %26 = vector.load %arg8[%c0_19, %c0_20] : memref<8x128xf32, #tpu.memory_space<vmem>>, vector<8x128xf32>
    tpu.vector_store %arg8[%c0_19, %c0_20], %25 {strides = array<i32>} : memref<8x128xf32, #tpu.memory_space<vmem>>, vector<8x128xf32>,
    return
  }
  func.func @transform_0(%arg0: i32) -> (i32, i32) {
    %c0_i32 = arith.constant 0 : i32
    %c0_i32_0 = arith.constant 0 : i32
    return %arg0, %c0_i32 : i32, i32
  }
  func.func @transform_1(%arg0: i32) -> (i32, i32) {
    %c0_i32 = arith.constant 0 : i32
    %c0_i32_0 = arith.constant 0 : i32
    %c0_i32_1 = arith.constant 0 : i32
    return %c0_i32, %c0_i32_0 : i32, i32
  }
  func.func @transform_2(%arg0: i32) -> (i32, i32) {
    %c0_i32 = arith.constant 0 : i32
    %c0_i32_0 = arith.constant 0 : i32
    %c0_i32_1 = arith.constant 0 : i32
    return %c0_i32, %c0_i32_0 : i32, i32
  }
  func.func @transform_3(%arg0: i32) -> (i32, i32) {
    %c0_i32 = arith.constant 0 : i32
    %c0_i32_0 = arith.constant 0 : i32
    %c0_i32_1 = arith.constant 0 : i32
    return %c0_i32, %c0_i32_0 : i32, i32
  }
  func.func @transform_4(%arg0: i32) -> (i32, i32) {
    %c0_i32 = arith.constant 0 : i32
    %c0_i32_0 = arith.constant 0 : i32
    %c0_i32_1 = arith.constant 0 : i32
    return %c0_i32, %c0_i32_0 : i32, i32
  }
  func.func @transform_5(%arg0: i32) -> (i32, i32) {
    %c0_i32 = arith.constant 0 : i32
    %c0_i32_0 = arith.constant 0 : i32
    %c0_i32_1 = arith.constant 0 : i32
    return %c0_i32, %c0_i32_0 : i32, i32
  }
  func.func @transform_6(%arg0: i32) -> (i32, i32) {
    %c0_i32 = arith.constant 0 : i32
    %c0_i32_0 = arith.constant 0 : i32
    %c0_i32_1 = arith.constant 0 : i32
    return %c0_i32, %c0_i32_0 : i32, i32
  }
  func.func @transform_7(%arg0: i32) -> (i32, i32) {
    %c0_i32 = arith.constant 0 : i32
    %c0_i32_0 = arith.constant 0 : i32
    return %arg0, %c0_i32 : i32, i32
  }
}

</mosaic_0001>

<bundles_post_ra>
// kernel: tpu_custom_call.1
= control target key start
LH: loop header
LB: loop body
LE: loop exit
PB: predicated region body
PF: predicated region fallthrough
CT: control target
= control target key end

     0   :  { %12 = vsyncpa [#allocation3], 0  ;;  %s901_s0 = inlined_call_operand.hbm [shape: f32[8,128], index: 0, kind: input, shape index: {}]   ;;  %s902_s1 = inlined_call_operand.hbm [shape: f32[128,128], index: 1, kind: input, shape index: {}]   ;;  %s903_s2 = inlined_call_operand.vmem [shape: f32[1,128], index: 2, kind: input, shape index: {}]   ;;  %s904_s3 = inlined_call_operand.hbm [shape: f32[128,128], index: 3, kind: input, shape index: {}]   ;;  %s905_s4 = inlined_call_operand.vmem [shape: f32[1,128], index: 4, kind: input, shape index: {}]   ;;  %s906_s5 = inlined_call_operand.hbm [shape: f32[128,128], index: 5, kind: input, shape index: {}]   ;;  %s907_s6 = inlined_call_operand.vmem [shape: f32[1,128], index: 6, kind: input, shape index: {}]   ;;  %s908_s7 = inlined_call_operand.hbm [shape: f32[8,128], index: 7, kind: output, shape index: {}]  }
   0x1   :  { %13 = vsyncpa [#allocation6], 0 }
   0x2   :  { %14 = vsyncpa [#allocation9], 0 }
   0x3   :  { %15 = vsyncpa [#allocation4], 0  ;;  %s743_s24 = smov [#allocation5]   ;;  %s625_s28 = scalar_lea.hbm %s902_s1, 2048 }
   0x4   :  { %s31_s25 = sshll.u32 %s743_s24, 4  ;;  %p626_p0 = scmp.ne.s32.totalorder %s902_s1, %s625_s28  ;;  %s32_s25 = int_to_ptr.vmem [resolvable:$true] %s31_s25 }
   0x5   :  { %p629_p1 = scmp.lt.u32.totalorder %s625_s28, %s902_s1 }
   0x7   :  { %p631_p2 = pnand %p629_p1, %p626_p0 }
   0x9   :  { %634 = shalt.err (!%p631_p2)
}
   0xa   :  { %s635_s10 = scalar_lea.vmem %s32_s25, 2048  ;;  %p640_p4 = scmp.lt.s32.totalorder %s32_s25, %s32_s25 }
   0xb   :  { %p636_p3 = scmp.ne.s32.totalorder %s32_s25, %s635_s10  ;;  %p641_p5 = scmp.lt.s32.totalorder %s635_s10, %s635_s10 }
   0xd   :  { %p642_p6 = por %p641_p5, %p640_p4 }
   0xf   :  { %p643_p7 = pnand %p642_p6, %p636_p3 }
  0x11   :  { %646 = shalt.err (!%p643_p7)
}
  0x12   :  { %s744_s11 = smov 128   ;;  %s745_s12 = smov 8  }
  0x13   :  { %37 = dma.hbm_to_vmem [thread:$0]  %s902_s1, 2048, %s32_s25, [#allocation6], %s744_s11, %s744_s11, %s745_s12  }
  0x14   :  { %s746_s15 = smov [#allocation2]   ;;  %s747_s17 = smov [#allocation7]  }
  0x15   :  { %s22_s16 = sshll.u32 %s746_s15, 4  ;;  %s45_s18 = sshll.u32 %s747_s17, 4  ;;  %s23_s16 = int_to_ptr.vmem [resolvable:$true] %s22_s16  ;;  %s46_s18 = int_to_ptr.vmem [resolvable:$true] %s45_s18 }
  0x16   :  { %s647_s21 = scalar_lea.hbm %s901_s0, 128 }
  0x17   :  { %p648_p8 = scmp.ne.s32.totalorder %s901_s0, %s647_s21  ;;  %p651_p9 = scmp.lt.u32.totalorder %s647_s21, %s901_s0 }
  0x19   :  { %p653_p10 = pnand %p651_p9, %p648_p8 }
  0x1b   :  { %656 = shalt.err (!%p653_p10)
}
  0x1c   :  { %s657_s1 = scalar_lea.vmem %s23_s16, 128  ;;  %p662_p12 = scmp.lt.s32.totalorder %s23_s16, %s23_s16 }
  0x1d   :  { %p658_p11 = scmp.ne.s32.totalorder %s23_s16, %s657_s1  ;;  %p663_p13 = scmp.lt.s32.totalorder %s657_s1, %s657_s1 }
  0x1f   :  { %p664_p0 = por %p663_p13, %p662_p12 }
  0x21   :  { %p665_p1 = pnand %p664_p0, %p658_p11 }
  0x23   :  { %668 = shalt.err (!%p665_p1)
}
  0x24   :  { %25 = dma.hbm_to_vmem [thread:$0]  %s901_s0, 128, %s23_s16, [#allocation3]  }
  0x25   :  { %s669_s30 = scalar_lea.hbm %s904_s3, 2048 }
  0x26   :  { %p670_p2 = scmp.ne.s32.totalorder %s904_s3, %s669_s30  ;;  %p673_p3 = scmp.lt.u32.totalorder %s669_s30, %s904_s3 }
  0x28   :  { %p675_p4 = pnand %p673_p3, %p670_p2 }
  0x2a   :  { %678 = shalt.err (!%p675_p4)
}
  0x2b   :  { %s679_s14 = scalar_lea.vmem %s46_s18, 2048  ;;  %p684_p6 = scmp.lt.s32.totalorder %s46_s18, %s46_s18 }
  0x2c   :  { %p680_p5 = scmp.ne.s32.totalorder %s46_s18, %s679_s14  ;;  %p685_p7 = scmp.lt.s32.totalorder %s679_s14, %s679_s14 }
  0x2e   :  { %p686_p8 = por %p685_p7, %p684_p6 }
  0x30   :  { %p687_p9 = pnand %p686_p8, %p680_p5 }
  0x32   :  { %690 = shalt.err (!%p687_p9)
}
  0x33   :  { %51 = dma.hbm_to_vmem [thread:$0]  %s904_s3, 2048, %s46_s18, [#allocation6], %s744_s11, %s744_s11, %s745_s12  }
  0x34   :  { %s748_s16 = smov [#allocation8]   ;;  %s691_s21 = scalar_lea.hbm %s906_s5, 2048 }
  0x35   :  { %s59_s17 = sshll.u32 %s748_s16, 4  ;;  %p692_p10 = scmp.ne.s32.totalorder %s906_s5, %s691_s21  ;;  %s60_s17 = int_to_ptr.vmem [resolvable:$true] %s59_s17 }
  0x36   :  { %p695_p11 = scmp.lt.u32.totalorder %s691_s21, %s906_s5 }
  0x38   :  { %p697_p12 = pnand %p695_p11, %p692_p10 }
  0x3a   :  { %700 = shalt.err (!%p697_p12)
}
  0x3b   :  { %s701_s1 = scalar_lea.vmem %s60_s17, 2048  ;;  %p706_p0 = scmp.lt.s32.totalorder %s60_s17, %s60_s17 }
  0x3c   :  { %p702_p13 = scmp.ne.s32.totalorder %s60_s17, %s701_s1  ;;  %p707_p1 = scmp.lt.s32.totalorder %s701_s1, %s701_s1 }
  0x3e   :  { %p708_p2 = por %p707_p1, %p706_p0 }
  0x40   :  { %p709_p3 = pnand %p708_p2, %p702_p13 }
  0x42   :  { %712 = shalt.err (!%p709_p3)
}
  0x43   :  { %65 = dma.hbm_to_vmem [thread:$0]  %s906_s5, 2048, %s60_s17, [#allocation9], %s744_s11, %s744_s11, %s745_s12  }
  0x44   :  { %735 = dma.done.wait [#allocation3], 128  }
  0x45   :  { %736 = vsyncadd [#allocation3], 4294967168 }
  0x46   :  { %737 = dma.done.wait [#allocation6], 4096  }
  0x47   :  { %738 = vsyncadd [#allocation6], 4294963200 }
  0x48   :  { %739 = dma.done.wait [#allocation9], 2048  }
  0x49   :  { %740 = vsyncadd [#allocation9], 4294965248  ;;  %v749_v0 = vmov 0.0|0.0   ;;  %vm750_vm0 = vmmov 0   ;;  %v751_v1 = vmov 0.0   ;;  %v81_v2 = vld [vmem:[#allocation5] sm:$0xff] }
  0x4a   :  { %543 = vmatprep.subr.bf16.mxu0 %v749_v0  ;;  %470 = vmatprep.mubr.msk.f32.mxu0 %vm750_vm0, %v751_v1  ;;  %v82_v3 = vld [vmem:[#allocation5 + $0x8] sm:$0xff]  ;;  %v83_v4 = vld [vmem:[#allocation5 + $0x10] sm:$0xff]  ;;  %v84_v6 = vld [vmem:[#allocation5 + $0x18] sm:$0xff]  ;;  %s752_s28 = smov [#allocation10]  }
  0x4b   :  { %567 = vmatprep.subr.bf16.mxu1 %v749_v0  ;;  %505 = vmatprep.mubr.msk.f32.mxu1 %vm750_vm0, %v751_v1  ;;  %v544_v5 = vpack.c.bf16 %v82_v3, %v81_v2  ;;  %v547_v7 = vpack.c.bf16 %v84_v6, %v83_v4  ;;  %v85_v8 = vld [vmem:[#allocation5 + $0x20] sm:$0xff]  ;;  %v86_v9 = vld [vmem:[#allocation5 + $0x28] sm:$0xff]  ;;  %v179_v12 = vld [vmem:[#allocation7 + $0x10] sm:$0xff]  ;;  %s373_s29 = sshll.u32 %s752_s28, 4  ;;  %s374_s29 = int_to_ptr.vmem [resolvable:$true] %s373_s29 }
  0x4c   :  { %v177_v10 = vld [vmem:[#allocation7] sm:$0xff]  ;;  %v178_v11 = vld [vmem:[#allocation7 + $0x8] sm:$0xff]  ;;  %v180_v13 = vld [vmem:[#allocation7 + $0x18] sm:$0xff]  ;;  %v550_v14 = vpack.c.bf16 %v86_v9, %v85_v8  ;;  %s713_s30 = scalar_lea.vmem %s374_s29, 128  ;;  %p718_p5 = scmp.lt.s32.totalorder %s374_s29, %s374_s29 }
  0x4d   :  { %545 = vmatpush3.bf16.msra.mxu0 %v544_v5  ;;  %v568_v15 = vpack.c.bf16 %v178_v11, %v177_v10  ;;  %v87_v16 = vld [vmem:[#allocation5 + $0x30] sm:$0xff]  ;;  %v88_v17 = vld [vmem:[#allocation5 + $0x38] sm:$0xff]  ;;  %v571_v18 = vpack.c.bf16 %v180_v13, %v179_v12  ;;  %v181_v19 = vld [vmem:[#allocation7 + $0x20] sm:$0xff]  ;;  %p714_p4 = scmp.ne.s32.totalorder %s374_s29, %s713_s30  ;;  %p719_p6 = scmp.lt.s32.totalorder %s713_s30, %s713_s30 }
  0x4e   :  { %546 = vmatprep.subr.bf16.mxu0 %v749_v0  ;;  %v182_v20 = vld [vmem:[#allocation7 + $0x28] sm:$0xff]  ;;  %v553_v21 = vpack.c.bf16 %v88_v17, %v87_v16  ;;  %v89_v22 = vld [vmem:[#allocation5 + $0x40] sm:$0xff]  ;;  %v183_v25 = vld [vmem:[#allocation7 + $0x30] sm:$0xff] }
  0x4f   :  { %569 = vmatpush3.bf16.msra.mxu1 %v568_v15  ;;  %v90_v23 = vld [vmem:[#allocation5 + $0x48] sm:$0xff]  ;;  %v574_v24 = vpack.c.bf16 %v182_v20, %v181_v19  ;;  %v184_v26 = vld [vmem:[#allocation7 + $0x38] sm:$0xff]  ;;  %v91_v28 = vld [vmem:[#allocation5 + $0x50] sm:$0xff]  ;;  %p720_p7 = por %p719_p6, %p718_p5 }
  0x50   :  { %570 = vmatprep.subr.bf16.mxu1 %v749_v0  ;;  %v556_v27 = vpack.c.bf16 %v90_v23, %v89_v22  ;;  %v92_v29 = vld [vmem:[#allocation5 + $0x58] sm:$0xff]  ;;  %v577_v30 = vpack.c.bf16 %v184_v26, %v183_v25  ;;  %v185_v31 = vld [vmem:[#allocation7 + $0x40] sm:$0xff]  ;;  %v186_v32 = vld [vmem:[#allocation7 + $0x48] sm:$0xff] }
  0x51   :  { %548 = vmatpush3.bf16.msra.mxu0 %v547_v7  ;;  %v559_v33 = vpack.c.bf16 %v92_v29, %v91_v28  ;;  %v93_v34 = vld [vmem:[#allocation5 + $0x60] sm:$0xff]  ;;  %v94_v35 = vld [vmem:[#allocation5 + $0x68] sm:$0xff]  ;;  %v580_v36 = vpack.c.bf16 %v186_v32, %v185_v31  ;;  %v187_v37 = vld [vmem:[#allocation7 + $0x50] sm:$0xff]  ;;  %p721_p8 = pnand %p720_p7, %p714_p4 }
  0x52   :  { %549 = vmatprep.subr.bf16.mxu0 %v749_v0  ;;  %v188_v38 = vld [vmem:[#allocation7 + $0x58] sm:$0xff]  ;;  %v562_v39 = vpack.c.bf16 %v94_v35, %v93_v34  ;;  %v95_v40 = vld [vmem:[#allocation5 + $0x70] sm:$0xff]  ;;  %v189_v43 = vld [vmem:[#allocation7 + $0x60] sm:$0xff] }
  0x53   :  { %572 = vmatpush3.bf16.msra.mxu1 %v571_v18  ;;  %v96_v41 = vld [vmem:[#allocation5 + $0x78] sm:$0xff]  ;;  %v583_v42 = vpack.c.bf16 %v188_v38, %v187_v37  ;;  %v190_v44 = vld [vmem:[#allocation7 + $0x68] sm:$0xff]  ;;  %v191_v48 = vld [vmem:[#allocation7 + $0x70] sm:$0xff] }
  0x54   :  { %573 = vmatprep.subr.bf16.mxu1 %v749_v0  ;;  %v565_v45 = vpack.c.bf16 %v96_v41, %v95_v40  ;;  %v586_v46 = vpack.c.bf16 %v190_v44, %v189_v43  ;;  %v80_v47 = vld [vmem:[#allocation2] sm:$0xff]  ;;  %v273_v51 = vld [vmem:[#allocation8] sm:$0xff]  ;;  %v274_v52 = vld [vmem:[#allocation8 + $0x8] sm:$0xff] }
  0x55   :  { %551 = vmatpush3.bf16.msra.mxu0 %v550_v14  ;;  %v192_v49 = vld [vmem:[#allocation7 + $0x78] sm:$0xff]  ;;  %v275_v53 = vld [vmem:[#allocation8 + $0x10] sm:$0xff]  ;;  %v592_v54 = vpack.c.bf16 %v274_v52, %v273_v51  ;;  %v277_v57 = vld [vmem:[#allocation8 + $0x20] sm:$0xff] }
  0x56   :  { %552 = vmatprep.subr.bf16.mxu0 %v749_v0  ;;  %v589_v50 = vpack.c.bf16 %v192_v49, %v191_v48  ;;  %v276_v55 = vld [vmem:[#allocation8 + $0x18] sm:$0xff]  ;;  %v278_v58 = vld [vmem:[#allocation8 + $0x28] sm:$0xff]  ;;  %v279_v60 = vld [vmem:[#allocation8 + $0x30] sm:$0xff] }
  0x57   :  { %575 = vmatpush3.bf16.msra.mxu1 %v574_v24  ;;  %v595_v56 = vpack.c.bf16 %v276_v55, %v275_v53  ;;  %v598_v59 = vpack.c.bf16 %v278_v58, %v277_v57  ;;  %v280_v61 = vld [vmem:[#allocation8 + $0x38] sm:$0xff]  ;;  %v281_v63 = vld [vmem:[#allocation8 + $0x40] sm:$0xff]  ;;  %v283_v3 = vld [vmem:[#allocation8 + $0x50] sm:$0xff] }
  0x58   :  { %576 = vmatprep.subr.bf16.mxu1 %v749_v0  ;;  %v601_v62 = vpack.c.bf16 %v280_v61, %v279_v60  ;;  %v284_v4 = vld [vmem:[#allocation8 + $0x58] sm:$0xff]  ;;  %v285_v6 = vld [vmem:[#allocation8 + $0x60] sm:$0xff]  ;;  %v286_v7 = vld [vmem:[#allocation8 + $0x68] sm:$0xff] }
  0x59   :  { %554 = vmatpush3.bf16.msra.mxu0 %v553_v21  ;;  %v607_v5 = vpack.c.bf16 %v284_v4, %v283_v3  ;;  %v610_v8 = vpack.c.bf16 %v286_v7, %v285_v6  ;;  %v384_v9 = vld [vmem:[%s903_s2] ss:$0 sm:$0xff]  ;;  %v287_v15 = vld [vmem:[#allocation8 + $0x70] sm:$0xff] }
  0x5a   :  { %555 = vmatprep.subr.bf16.mxu0 %v749_v0  ;;  %v288_v16 = vld [vmem:[#allocation8 + $0x78] sm:$0xff] }
  0x5b   :  { %578 = vmatpush3.bf16.msra.mxu1 %v577_v30  ;;  %v613_v17 = vpack.c.bf16 %v288_v16, %v287_v15  ;;  %v385_v18 = vld [vmem:[%s905_s4] ss:$0 sm:$0xff] }
  0x5c   :  { %579 = vmatprep.subr.bf16.mxu1 %v749_v0  ;;  %v386_v23 = vld [vmem:[%s907_s6] ss:$0 sm:$0xff] }
  0x5d   :  { %557 = vmatpush3.bf16.msra.mxu0 %v556_v27 }
  0x5e   :  { %558 = vmatprep.subr.bf16.mxu0 %v749_v0 }
  0x5f   :  { %581 = vmatpush3.bf16.msra.mxu1 %v580_v36 }
  0x60   :  { %582 = vmatprep.subr.bf16.mxu1 %v749_v0 }
  0x61   :  { %560 = vmatpush3.bf16.msra.mxu0 %v559_v33 }
  0x62   :  { %561 = vmatprep.subr.bf16.mxu0 %v749_v0 }
  0x63   :  { %584 = vmatpush3.bf16.msra.mxu1 %v583_v42 }
  0x64   :  { %585 = vmatprep.subr.bf16.mxu1 %v749_v0 }
  0x65   :  { %563 = vmatpush3.bf16.msra.mxu0 %v562_v39 }
  0x66   :  { %564 = vmatprep.subr.bf16.mxu0 %v749_v0 }
  0x67   :  { %587 = vmatpush3.bf16.msra.mxu1 %v586_v46 }
  0x68   :  { %588 = vmatprep.subr.bf16.mxu1 %v749_v0 }
  0x69   :  { %566 = vmatpush3.bf16.msra.mxu0 %v565_v45 }
  0x6a   :  { %591 = vmatprep.subr.bf16.mxu0 %v749_v0 }
  0x6b   :  { %590 = vmatpush3.bf16.msra.mxu1 %v589_v50 }
  0x6c   :  { %471 = vmatmul.mubr.f32.vlgmr.msra.gmra.mrb[0].mxu0 %v80_v47 }
  0x6d   :  { %540 = vmatprep.mubr.msk.f32.mxu0 %vm750_vm0, %v751_v1  ;;  %593 = vmatpush3.bf16.msra.mxu0 %v592_v54  ;;  %v282_v1 = vld [vmem:[#allocation8 + $0x48] sm:$0xff] }
  0x6e   :  { %594 = vmatprep.subr.bf16.mxu0 %v749_v0  ;;  %v604_v2 = vpack.c.bf16 %v282_v1, %v281_v63 }
  0x71   :  { %596 = vmatpush3.bf16.msra.mxu0 %v595_v56 }
  0x72   :  { %597 = vmatprep.subr.bf16.mxu0 %v749_v0 }
  0x75   :  { %599 = vmatpush3.bf16.msra.mxu0 %v598_v59 }
  0x76   :  { %600 = vmatprep.subr.bf16.mxu0 %v749_v0 }
  0x79   :  { %602 = vmatpush3.bf16.msra.mxu0 %v601_v62 }
  0x7a   :  { %603 = vmatprep.subr.bf16.mxu0 %v749_v0 }
  0x7d   :  { %605 = vmatpush3.bf16.msra.mxu0 %v604_v2 }
  0x7e   :  { %606 = vmatprep.subr.bf16.mxu0 %v749_v0 }
  0x81   :  { %608 = vmatpush3.bf16.msra.mxu0 %v607_v5 }
  0x82   :  { %609 = vmatprep.subr.bf16.mxu0 %v749_v0 }
  0x85   :  { %611 = vmatpush3.bf16.msra.mxu0 %v610_v8 }
  0x86   :  { %612 = vmatprep.subr.bf16.mxu0 %v749_v0 }
  0x89   :  { %614 = vmatpush3.bf16.msra.mxu0 %v613_v17 }
 0x13f   :  { %v170_v10 = vpop.f32.mrb[0].mxu0 }
 0x140   :  { %v171_v11 = vadd.f32 %v384_v9, %v170_v10  ;;  %v472_v12 = vpop.f32.mrb[1].mxu0 }
 0x142   :  { %v175_v13 = vmul.f32 0.01, %v171_v11  ;;  %vm174_vm1 = vcmp.ge.f32.partialorder %v171_v11, 0.0 }
 0x144   :  { %v176_v14 = vsel %vm174_vm1, %v171_v11, %v175_v13 }
 0x145   :  { %506 = vmatmul.mubr.f32.vlgmr.msra.gmra.mrb[0].mxu1 %v176_v14 }
 0x218   :  { %v266_v0 = vpop.f32.mrb[0].mxu1 }
 0x219   :  { %v267_v19 = vadd.f32 %v385_v18, %v266_v0  ;;  %v507_v20 = vpop.f32.mrb[1].mxu1 }
 0x21b   :  { %vm270_vm2 = vcmp.ge.f32.partialorder %v267_v19, 0.0  ;;  %v271_v21 = vmul.f32 0.01, %v267_v19 }
 0x21d   :  { %v272_v22 = vsel %vm270_vm2, %v267_v19, %v271_v21 }
 0x21e   :  { %541 = vmatmul.mubr.f32.vlgmr.msra.gmra.mrb[2].mxu0 %v272_v22 }
 0x2f1   :  { %v362_v24 = vpop.f32.mrb[2].mxu0 }
 0x2f2   :  { %v363_v25 = vadd.f32 %v386_v23, %v362_v24  ;;  %v542_v26 = vpop.f32.mrb[3].mxu0 }
 0x2f4   :  { %366 = vst [vmem:[#allocation10] sm:$0xff] %v363_v25 }
 0x2f5   :  { %724 = shalt.err (!%p721_p8)
}
 0x2f6   :  { %s725_s9 = scalar_lea.hbm %s908_s7, 128 }
 0x2f7   :  { %p726_p9 = scmp.ne.s32.totalorder %s908_s7, %s725_s9  ;;  %p729_p10 = scmp.lt.u32.totalorder %s725_s9, %s908_s7 }
 0x2f9   :  { %p731_p11 = pnand %p729_p10, %p726_p9 }
 0x2fb   :  { %734 = shalt.err (!%p731_p11)
}
 0x2fc   :  { %376 = dma.vmem_to_hbm [thread:$0]  %s374_s29, 128, %s908_s7, [#allocation4]  }
 0x2fd   :  { %741 = dma.done.wait [#allocation4], 128  }
 0x2fe   :  { %742 = vsyncadd [#allocation4], 4294967168 }
 0x2ff   :  { %380 = vsyncpa [#allocation3], 1 }
 0x300   :  { %381 = vsyncpa [#allocation6], 1 }
 0x301   :  { %382 = vsyncpa [#allocation9], 1 }
 0x302   :  { %383 = vsyncpa [#allocation4], 1 }

</bundles_post_ra>
